<compile_context>
chip_gen: v6e
topology: v6e:2x2x1
jax: 0.10.0
libtpu: 0.0.40
codegen_flags: <defaults>
</compile_context>

<pallas_src>
import functools

import numpy as np
import jax
import jax.numpy as jnp
from jax.experimental import pallas as pl
from jax.experimental.pallas import tpu as pltpu


# ----------------------------------------------------------------------------
# In-kernel helpers (all math in f32 on the VPU/EUP; matmuls accumulate f32)
# ----------------------------------------------------------------------------
def _ln(x, g_ref, b_ref, eps):
    """LayerNorm over the last dim. x: f32 (rows, D); g/b refs: (1, D)."""
    g = g_ref[...].astype(jnp.float32)
    b = b_ref[...].astype(jnp.float32)
    mu = jnp.mean(x, axis=-1, keepdims=True)
    var = jnp.mean(jnp.square(x - mu), axis=-1, keepdims=True)
    return (x - mu) * jax.lax.rsqrt(var + eps) * g + b


def _softmax_rows(s):
    """Row softmax; reciprocal goes to the EUP slot (approx)."""
    m = jnp.max(s, axis=-1, keepdims=True)
    p = jnp.exp(s - m)
    return p * pl.reciprocal(jnp.sum(p, axis=-1, keepdims=True), approx=True)


def _gelu_tanh(x):
    # TODO(synk): reference timm ViT uses exact erf-GELU; tanh-approx GELU is
    # used here so the whole MLP stays inside the fused kernel (erf lowering
    # availability in Mosaic varies).  Max deviation is ~1e-3 per activation.
    c = np.sqrt(2.0 / np.pi).astype(np.float32)
    return 0.5 * x * (1.0 + jnp.tanh(c * (x + 0.044715 * x * x * x)))


# ----------------------------------------------------------------------------
# Pallas kernels
# ----------------------------------------------------------------------------
def _linear_bias_kernel(x_ref, w_ref, b_ref, o_ref, *, activation):
    y = jnp.dot(x_ref[...].astype(jnp.float32), w_ref[...].astype(jnp.float32),
                preferred_element_type=jnp.float32) + b_ref[...].astype(jnp.float32)
    if activation == "relu":
        y = jnp.maximum(y, 0.0)
    o_ref[...] = y.astype(o_ref.dtype)


def _linear_nobias_kernel(x_ref, w_ref, o_ref, *, activation):
    y = jnp.dot(x_ref[...].astype(jnp.float32), w_ref[...].astype(jnp.float32),
                preferred_element_type=jnp.float32)
    if activation == "relu":
        y = jnp.maximum(y, 0.0)
    o_ref[...] = y.astype(o_ref.dtype)


def linear(x, w, b=None, activation="none"):
    """y = x @ w (+ b).  w stored (in_features, out_features)."""
    *lead, K = x.shape
    N = w.shape[1]
    M = int(np.prod(lead)) if lead else 1
    x2 = x.reshape(M, K)

    # M-tiled "parallel" grid when the row count is large; single block otherwise.
    if M >= 512 and M % 256 == 0:
        tm = 256
    else:
        tm = M
    grid = (M // tm,)

    in_specs = [pl.BlockSpec((tm, K), lambda i: (i, 0)),
                pl.BlockSpec((K, N), lambda i: (0, 0))]
    args = [x2, w]
    if b is not None:
        in_specs.append(pl.BlockSpec((1, N), lambda i: (0, 0)))
        args.append(b.reshape(1, N))
        kern = functools.partial(_linear_bias_kernel, activation=activation)
    else:
        kern = functools.partial(_linear_nobias_kernel, activation=activation)

    out = pl.pallas_call(
        kern,
        out_shape=jax.ShapeDtypeStruct((M, N), jnp.float32),
        grid=grid,
        in_specs=in_specs,
        out_specs=pl.BlockSpec((tm, N), lambda i: (i, 0)),
        compiler_params=pltpu.CompilerParams(dimension_semantics=("parallel",)),
    )(*args)
    return out.reshape(*lead, N)


def _vit_block_kernel(x_ref, n1g, n1b, qkvw, qkvb, projw, projb,
                      n2g, n2b, fc1w, fc1b, fc2w, fc2b, o_ref,
                      *, heads, eps):
    """One full timm-ViT encoder block, fused, for a single batch element."""
    x = x_ref[...].astype(jnp.float32)              # (N, D)
    D = x.shape[-1]
    Dh = D // heads
    scale = Dh ** -0.5

    # --- Attention: LN1 -> QKV -> per-head softmax(QK^T)V -> proj -> residual
    h1 = _ln(x, n1g, n1b, eps)
    qkv = jnp.dot(h1, qkvw[...].astype(jnp.float32),
                  preferred_element_type=jnp.float32) + qkvb[...].astype(jnp.float32)
    projw_f = projw[...].astype(jnp.float32)
    attn_proj = projb[...].astype(jnp.float32)      # (1, D), broadcasts over N
    for hd in range(heads):                          # static unroll, heads is small
        q = qkv[:, hd * Dh:(hd + 1) * Dh]
        k = qkv[:, D + hd * Dh:D + (hd + 1) * Dh]
        v = qkv[:, 2 * D + hd * Dh:2 * D + (hd + 1) * Dh]
        s = jax.lax.dot_general(q, k, (((1,), (1,)), ((), ())),
                                preferred_element_type=jnp.float32) * scale
        p = _softmax_rows(s)
        o_h = jnp.dot(p, v, preferred_element_type=jnp.float32)
        # Fold the head output directly into the output projection: no (N, Dh)
        # narrow store, no concatenate -- result stays lane-dense (N, D).
        attn_proj = attn_proj + jnp.dot(o_h, projw_f[hd * Dh:(hd + 1) * Dh, :],
                                        preferred_element_type=jnp.float32)
    x = x + attn_proj

    # --- MLP: LN2 -> fc1 -> GELU -> fc2 -> residual
    h2 = _ln(x, n2g, n2b, eps)
    h2 = jnp.dot(h2, fc1w[...].astype(jnp.float32),
                 preferred_element_type=jnp.float32) + fc1b[...].astype(jnp.float32)
    h2 = _gelu_tanh(h2)
    x = x + jnp.dot(h2, fc2w[...].astype(jnp.float32),
                    preferred_element_type=jnp.float32) + fc2b[...].astype(jnp.float32)
    o_ref[...] = x.astype(o_ref.dtype)


def vit_block(x, p, heads):
    """Fused ViT block: one pallas_call, grid over batch (parallel)."""
    B, N, D = x.shape
    H = p["fc1_w"].shape[1]

    def w2d(shape):
        return pl.BlockSpec(shape, lambda b: (0, 0))

    return pl.pallas_call(
        functools.partial(_vit_block_kernel, heads=heads, eps=1e-6),
        out_shape=jax.ShapeDtypeStruct((B, N, D), jnp.float32),
        grid=(B,),
        in_specs=[
            pl.BlockSpec((None, N, D), lambda b: (b, 0, 0)),
            w2d((1, D)), w2d((1, D)),
            w2d((D, 3 * D)), w2d((1, 3 * D)),
            w2d((D, D)), w2d((1, D)),
            w2d((1, D)), w2d((1, D)),
            w2d((D, H)), w2d((1, H)),
            w2d((H, D)), w2d((1, D)),
        ],
        out_specs=pl.BlockSpec((None, N, D), lambda b: (b, 0, 0)),
        compiler_params=pltpu.CompilerParams(dimension_semantics=("parallel",)),
    )(x,
      p["norm1_g"].reshape(1, D), p["norm1_b"].reshape(1, D),
      p["qkv_w"], p["qkv_b"].reshape(1, 3 * D),
      p["proj_w"], p["proj_b"].reshape(1, D),
      p["norm2_g"].reshape(1, D), p["norm2_b"].reshape(1, D),
      p["fc1_w"], p["fc1_b"].reshape(1, H),
      p["fc2_w"], p["fc2_b"].reshape(1, D))


def _cross_block_kernel(x_ref, ng, nb, kw, vw, qw, ow, ob, gw, gb, o_ref,
                        *, heads, dim_head, eps):
    """Fused PreNorm + CrossAttention + cal_q residual + trailing g linear.

    x_ref is the concatenated (cal_q | patch tokens) sequence for one batch
    element; cal_q == row 0, so the residual uses x[0:1].
    """
    x = x_ref[...].astype(jnp.float32)              # (N, D)
    xn = _ln(x, ng, nb, eps)
    k = jnp.dot(xn, kw[...].astype(jnp.float32), preferred_element_type=jnp.float32)
    v = jnp.dot(xn, vw[...].astype(jnp.float32), preferred_element_type=jnp.float32)
    q = jnp.dot(xn[0:1, :], qw[...].astype(jnp.float32),
                preferred_element_type=jnp.float32)  # query = first token only
    owf = ow[...].astype(jnp.float32)
    scale = dim_head ** -0.5
    attn_out = ob[...].astype(jnp.float32)           # (1, D)
    for hd in range(heads):
        sl = slice(hd * dim_head, (hd + 1) * dim_head)
        s = jax.lax.dot_general(q[:, sl], k[:, sl], (((1,), (1,)), ((), ())),
                                preferred_element_type=jnp.float32) * scale   # (1, N)
        p = _softmax_rows(s)
        o_h = jnp.dot(p, v[:, sl], preferred_element_type=jnp.float32)        # (1, dh)
        attn_out = attn_out + jnp.dot(o_h, owf[sl, :],
                                      preferred_element_type=jnp.float32)
    res = x[0:1, :] + attn_out                       # cal_q + cross_attn(cal_qkv)
    y = jnp.dot(res, gw[...].astype(jnp.float32),
                preferred_element_type=jnp.float32) + gb[...].astype(jnp.float32)
    o_ref[...] = y.astype(o_ref.dtype)


def cross_attention_block(cal_qkv, cross_p, g_w, g_b, heads, dim_head):
    """Returns g(cal_q + CrossAttention(PreNorm(cal_qkv))) with shape (B, 1, Dout)."""
    B, N, D = cal_qkv.shape
    attn = cross_p["attn"]
    inner = heads * dim_head
    Dout = g_w.shape[1]

    def w2d(shape):
        return pl.BlockSpec(shape, lambda b: (0, 0))

    # project_out=True branch of the reference (heads=2 != 1); to_out is Linear.
    return pl.pallas_call(
        functools.partial(_cross_block_kernel, heads=heads, dim_head=dim_head,
                          eps=1e-5),
        out_shape=jax.ShapeDtypeStruct((B, 1, Dout), jnp.float32),
        grid=(B,),
        in_specs=[
            pl.BlockSpec((None, N, D), lambda b: (b, 0, 0)),
            w2d((1, D)), w2d((1, D)),
            w2d((D, inner)), w2d((D, inner)), w2d((D, inner)),
            w2d((inner, D)), w2d((1, D)),
            w2d((D, Dout)), w2d((1, Dout)),
        ],
        out_specs=pl.BlockSpec((None, 1, Dout), lambda b: (b, 0, 0)),
        compiler_params=pltpu.CompilerParams(dimension_semantics=("parallel",)),
    )(cal_qkv,
      cross_p["norm_g"].reshape(1, D), cross_p["norm_b"].reshape(1, D),
      attn["to_k_w"], attn["to_v_w"], attn["to_q_w"],
      attn["to_out_w"], attn["to_out_b"].reshape(1, D),
      g_w, g_b.reshape(1, Dout))


def _head_kernel(cs_ref, cl_ref, sg, sb, lg, lb, w1, b1, w2, b2, o_ref, *, eps):
    """Final LN of both cls tokens + concat + Linear -> ReLU -> Linear."""
    cs = _ln(cs_ref[...].astype(jnp.float32), sg, sb, eps)
    cl = _ln(cl_ref[...].astype(jnp.float32), lg, lb, eps)
    D = cs.shape[-1]
    w1f = w1[...].astype(jnp.float32)
    # concat(cs, cl) @ w1 == cs @ w1[:D] + cl @ w1[D:]
    h = (jnp.dot(cs, w1f[:D, :], preferred_element_type=jnp.float32)
         + jnp.dot(cl, w1f[D:, :], preferred_element_type=jnp.float32)
         + b1[...].astype(jnp.float32))
    h = jnp.maximum(h, 0.0)
    y = jnp.dot(h, w2[...].astype(jnp.float32),
                preferred_element_type=jnp.float32) + b2[...].astype(jnp.float32)
    o_ref[...] = y.astype(o_ref.dtype)


def head_forward(cls_s, cls_l, ms, ml, head_p, num_classes):
    B, D = cls_s.shape
    H = head_p["w1"].shape[1]
    C = head_p["w2"].shape[1]
    Cp = ((C + 127) // 128) * 128          # lane-dense (multiple-of-128) output
    w2 = jnp.pad(head_p["w2"], ((0, 0), (0, Cp - C)))
    b2 = jnp.pad(head_p["b2"], ((0, Cp - C),))

    out = pl.pallas_call(
        functools.partial(_head_kernel, eps=1e-6),
        out_shape=jax.ShapeDtypeStruct((B, Cp), jnp.float32),
        grid=(1,),
        in_specs=[
            pl.BlockSpec((B, D), lambda i: (0, 0)),
            pl.BlockSpec((B, D), lambda i: (0, 0)),
            pl.BlockSpec((1, D), lambda i: (0, 0)),
            pl.BlockSpec((1, D), lambda i: (0, 0)),
            pl.BlockSpec((1, D), lambda i: (0, 0)),
            pl.BlockSpec((1, D), lambda i: (0, 0)),
            pl.BlockSpec((2 * D, H), lambda i: (0, 0)),
            pl.BlockSpec((1, H), lambda i: (0, 0)),
            pl.BlockSpec((H, Cp), lambda i: (0, 0)),
            pl.BlockSpec((1, Cp), lambda i: (0, 0)),
        ],
        out_specs=pl.BlockSpec((B, Cp), lambda i: (0, 0)),
    )(cls_s, cls_l,
      ms["norm_g"].reshape(1, D), ms["norm_b"].reshape(1, D),
      ml["norm_g"].reshape(1, D), ml["norm_b"].reshape(1, D),
      head_p["w1"], head_p["b1"].reshape(1, H),
      w2, b2.reshape(1, Cp))
    return out[:, :num_classes]


# ----------------------------------------------------------------------------
# Model glue (reshapes / concats / cls+pos bookkeeping only)
# ----------------------------------------------------------------------------
def patch_embed(x, p, patch):
    # x: (B, C, H, W) NCHW  ->  (B, N, D)
    B, C, H, W = x.shape
    Hp, Wp = H // patch, W // patch
    patches = x.reshape(B, C, Hp, patch, Wp, patch)
    patches = patches.transpose(0, 2, 4, 1, 3, 5).reshape(B, Hp * Wp, C * patch * patch)
    return linear(patches, p["proj_w"], p["proj_b"])


def forward_features(x_img, mp, patch, cross_depth):
    x = patch_embed(x_img, mp["patch_embed"], patch)
    B = x.shape[0]
    cls = jnp.broadcast_to(mp["cls_token"], (B, 1, mp["cls_token"].shape[-1]))
    x = jnp.concatenate([cls, x], axis=1)
    x = x + mp["pos_embed"]          # pos_drop = identity (eval)
    for blk in mp["blocks"][:cross_depth]:
        x = vit_block(x, blk, mp["heads"])
    return x


def finish_forward_features(x, mp, cross_depth):
    for blk in mp["blocks"][cross_depth:]:
        x = vit_block(x, blk, mp["heads"])
    return x


# ----------------------------------------------------------------------------
# DoubleViT forward
# ----------------------------------------------------------------------------
def double_vit_forward(params, cfg, x):
    s_out = forward_features(x, params["model_s"], cfg["patch_s"], cfg["cross_depth"])
    l_out = forward_features(x, params["model_l"], cfg["patch_l"], cfg["cross_depth"])

    ca = params["cross"]
    heads = cfg["cross_heads"]
    dh = cfg["cross_dim_head"]

    small_class = s_out[:, 0]
    x_small = s_out[:, 1:]
    large_class = l_out[:, 0]
    x_large = l_out[:, 1:]

    # large class token attends over small patch tokens
    cal_q = linear(large_class[:, None, :], ca["f_ls"]["w"], ca["f_ls"]["b"])
    cal_qkv = jnp.concatenate([cal_q, x_small], axis=1)
    cal_out = cross_attention_block(cal_qkv, ca["cross_l"],
                                    ca["g_sl"]["w"], ca["g_sl"]["b"], heads, dh)
    s_out_new = jnp.concatenate([cal_out, x_large], axis=1)

    # small class token attends over large patch tokens
    cal_q = linear(small_class[:, None, :], ca["f_sl"]["w"], ca["f_sl"]["b"])
    cal_qkv = jnp.concatenate([cal_q, x_large], axis=1)
    cal_out = cross_attention_block(cal_qkv, ca["cross_s"],
                                    ca["g_ls"]["w"], ca["g_ls"]["b"], heads, dh)
    l_out_new = jnp.concatenate([cal_out, x_small], axis=1)

    s_out = finish_forward_features(s_out_new, params["model_s"], cfg["cross_depth"])
    l_out = finish_forward_features(l_out_new, params["model_l"], cfg["cross_depth"])

    # fused: final LayerNorm of cls tokens + concat + head MLP (dropout = id)
    return head_forward(s_out[:, 0], l_out[:, 0],
                        params["model_s"], params["model_l"],
                        params["head"], cfg["num_classes"])


# ----------------------------------------------------------------------------
# Deterministic parameter initialization
# ----------------------------------------------------------------------------
def _dense(key, fan_in, fan_out):
    return jax.random.normal(key, (fan_in, fan_out), jnp.float32) * 0.02


def _init_vit(kit, depth, num_patches, D, heads, mlp_hidden, patch, C):
    p = {"heads": heads}
    p["patch_embed"] = {"proj_w": _dense(next(kit), C * patch * patch, D),
                        "proj_b": jnp.zeros((D,), jnp.float32)}
    p["cls_token"] = jax.random.normal(next(kit), (1, 1, D), jnp.float32) * 0.02
    p["pos_embed"] = jax.random.normal(next(kit), (1, num_patches + 1, D), jnp.float32) * 0.02
    blocks = []
    for _ in range(depth):
        blocks.append({
            "norm1_g": jnp.ones((D,), jnp.float32), "norm1_b": jnp.zeros((D,), jnp.float32),
            "qkv_w": _dense(next(kit), D, 3 * D), "qkv_b": jnp.zeros((3 * D,), jnp.float32),
            "proj_w": _dense(next(kit), D, D), "proj_b": jnp.zeros((D,), jnp.float32),
            "norm2_g": jnp.ones((D,), jnp.float32), "norm2_b": jnp.zeros((D,), jnp.float32),
            "fc1_w": _dense(next(kit), D, mlp_hidden), "fc1_b": jnp.zeros((mlp_hidden,), jnp.float32),
            "fc2_w": _dense(next(kit), mlp_hidden, D), "fc2_b": jnp.zeros((D,), jnp.float32),
        })
    p["blocks"] = blocks
    p["norm_g"] = jnp.ones((D,), jnp.float32)
    p["norm_b"] = jnp.zeros((D,), jnp.float32)
    return p


def _init_cross(kit, small_dim, large_dim, heads, dim_head):
    inner = heads * dim_head

    def lin(din, dout):
        return {"w": _dense(next(kit), din, dout), "b": jnp.zeros((dout,), jnp.float32)}

    def attn(dim):
        return {"norm_g": jnp.ones((dim,), jnp.float32),
                "norm_b": jnp.zeros((dim,), jnp.float32),
                "attn": {"to_k_w": _dense(next(kit), dim, inner),
                         "to_v_w": _dense(next(kit), dim, inner),
                         "to_q_w": _dense(next(kit), dim, inner),
                         "to_out_w": _dense(next(kit), inner, dim),
                         "to_out_b": jnp.zeros((dim,), jnp.float32)}}

    return {"f_sl": lin(small_dim, large_dim),
            "g_ls": lin(large_dim, small_dim),
            "cross_s": attn(large_dim),
            "f_ls": lin(large_dim, small_dim),
            "g_sl": lin(small_dim, large_dim),
            "cross_l": attn(small_dim)}


def init_double_vit(key, cfg):
    kit = iter(jax.random.split(key, 128))
    D = cfg["dim"]
    n_s = (cfg["image_size"] // cfg["patch_s"]) ** 2
    n_l = (cfg["image_size"] // cfg["patch_l"]) ** 2
    params = {
        "model_s": _init_vit(kit, cfg["depth"], n_s, D, cfg["vit_heads"],
                             cfg["mlp_hidden"], cfg["patch_s"], cfg["in_chans"]),
        "model_l": _init_vit(kit, cfg["depth"], n_l, D, cfg["vit_heads"],
                             cfg["mlp_hidden"], cfg["patch_l"], cfg["in_chans"]),
        "cross": _init_cross(kit, D, D, cfg["cross_heads"], cfg["cross_dim_head"]),
        "head": {"w1": _dense(next(kit), 2 * D, D), "b1": jnp.zeros((D,), jnp.float32),
                 "w2": _dense(next(kit), D, cfg["num_classes"]),
                 "b2": jnp.zeros((cfg["num_classes"],), jnp.float32)},
    }
    return params


# ----------------------------------------------------------------------------
if __name__ == "__main__":
    cfg = dict(
        image_size=32, in_chans=3,
        patch_s=8, patch_l=16,          # small tower: 16 patches, large tower: 4 patches
        dim=64, vit_heads=4, mlp_hidden=128, depth=4,
        cross_depth=-3,
        cross_heads=2, cross_dim_head=16,
        num_classes=200,
    )

    key = jax.random.PRNGKey(0)
    kp, kx = jax.random.split(key)
    params = init_double_vit(kp, cfg)
    x = jax.random.normal(kx, (2, cfg["in_chans"], cfg["image_size"], cfg["image_size"]),
                          jnp.float32)

    out = double_vit_forward(params, cfg, x)
    out = jax.block_until_ready(out)
    assert out.shape == (2, cfg["num_classes"]), out.shape
    assert bool(jnp.all(jnp.isfinite(out)))
    print("KERNEL_OK")
</pallas_src>

<mosaic_0001>
module attributes {stable_mosaic.version = 11 : i64} {
  func.func @_linear_bias_kernel(%arg0: i32, %arg1: memref<32x192xf32, #tpu.memory_space<vmem>>, %arg2: memref<192x64xf32, #tpu.memory_space<vmem>>, %arg3: memref<1x64xf32, #tpu.memory_space<vmem>>, %arg4: memref<32x64xf32, #tpu.memory_space<vmem>>) attributes {dimension_semantics = [#tpu.dimension_semantics<parallel>], iteration_bounds = array<i64: 1>, scalar_prefetch = 0 : i64, scratch_operands = 0 : i64, tpu.core_type = #tpu.core_type<tc>, window_params = [{transform_indices = @transform_0, window_bounds = array<i64: 32, 192>}, {pipeline_mode = #tpu.pipeline_mode<synchronous>, transform_indices = @transform_1, window_bounds = array<i64: 192, 64>}, {pipeline_mode = #tpu.pipeline_mode<synchronous>, transform_indices = @transform_2, window_bounds = array<i64: 1, 64>}, {transform_indices = @transform_3, window_bounds = array<i64: 32, 64>}]} {
    %c0 = arith.constant 0 : index
    %c0_0 = arith.constant 0 : index
    %0 = vector.load %arg1[%c0, %c0_0] : memref<32x192xf32, #tpu.memory_space<vmem>>, vector<32x192xf32>
    %c0_1 = arith.constant 0 : index
    %c0_2 = arith.constant 0 : index
    %1 = vector.load %arg2[%c0_1, %c0_2] : memref<192x64xf32, #tpu.memory_space<vmem>>, vector<192x64xf32>
    %cst = arith.constant dense<0.000000e+00> : vector<32x64xf32>
    %2 = tpu.matmul %0, %1, %cst {dimension_numbers = #tpu.dot_dimension_numbers<[1], [0], [0], [1], [0, 0, 1, 1], [], []>} : vector<32x192xf32>, vector<192x64xf32>, vector<32x64xf32> -> vector<32x64xf32>
    %c0_3 = arith.constant 0 : index
    %c0_4 = arith.constant 0 : index
    %3 = vector.load %arg3[%c0_3, %c0_4] : memref<1x64xf32, #tpu.memory_space<vmem>>, vector<1x64xf32>
    %4 = vector.broadcast %3 : vector<1x64xf32> to vector<32x64xf32>
    %5 = arith.addf %2, %4 : vector<32x64xf32>
    %c0_5 = arith.constant 0 : index
    %c0_6 = arith.constant 0 : index
    %6 = vector.load %arg4[%c0_5, %c0_6] : memref<32x64xf32, #tpu.memory_space<vmem>>, vector<32x64xf32>
    tpu.vector_store %arg4[%c0_5, %c0_6], %5 {strides = array<i32>} : memref<32x64xf32, #tpu.memory_space<vmem>>, vector<32x64xf32>,
    return
  }
  func.func @transform_0(%arg0: i32) -> (i32, i32) {
    %c0_i32 = arith.constant 0 : i32
    %c0_i32_0 = arith.constant 0 : i32
    return %arg0, %c0_i32 : i32, i32
  }
  func.func @transform_1(%arg0: i32) -> (i32, i32) {
    %c0_i32 = arith.constant 0 : i32
    %c0_i32_0 = arith.constant 0 : i32
    %c0_i32_1 = arith.constant 0 : i32
    return %c0_i32, %c0_i32_0 : i32, i32
  }
  func.func @transform_2(%arg0: i32) -> (i32, i32) {
    %c0_i32 = arith.constant 0 : i32
    %c0_i32_0 = arith.constant 0 : i32
    %c0_i32_1 = arith.constant 0 : i32
    return %c0_i32, %c0_i32_0 : i32, i32
  }
  func.func @transform_3(%arg0: i32) -> (i32, i32) {
    %c0_i32 = arith.constant 0 : i32
    %c0_i32_0 = arith.constant 0 : i32
    return %arg0, %c0_i32 : i32, i32
  }
}

</mosaic_0001>

<bundles_post_ra>
// kernel: tpu_custom_call.1
= control target key start
LH: loop header
LB: loop body
LE: loop exit
PB: predicated region body
PF: predicated region fallthrough
CT: control target
= control target key end

     0   :  { %v251_v1 = vmov 0.0   ;;  %s433_s0 = inlined_call_operand.vmem [shape: f32[32,192], index: 0, kind: input, shape index: {}]   ;;  %s434_s1 = inlined_call_operand.vmem [shape: f32[192,64], index: 1, kind: input, shape index: {}]   ;;  %s435_s2 = inlined_call_operand.vmem [shape: f32[1,64], index: 2, kind: input, shape index: {}]   ;;  %s436_s3 = inlined_call_operand.hbm [shape: f32[32,64], index: 3, kind: output, shape index: {}]  }
   0x1   :  { %v38_v0 = vld [vmem:[%s434_s1 + $0x78] sm:$0xff]  ;;  %67 = vmatprep.subr.mxu0 %v251_v1  ;;  %177 = vmatprep.subr.mxu1 %v251_v1  ;;  %v37_v2 = vld [vmem:[%s434_s1 + $0x70] sm:$0xff]  ;;  %v36_v3 = vld [vmem:[%s434_s1 + $0x68] sm:$0xff] }
   0x2   :  { %68 = vmatpush1.msra.mxu0 %v38_v0  ;;  %201 = vmatpush1.msra.mxu1 %v38_v0  ;;  %v35_v4 = vld [vmem:[%s434_s1 + $0x60] sm:$0xff]  ;;  %v34_v5 = vld [vmem:[%s434_s1 + $0x58] sm:$0xff]  ;;  %v33_v6 = vld [vmem:[%s434_s1 + $0x50] sm:$0xff] }
   0x3   :  { %69 = vmatprep.subr.mxu0 %v251_v1  ;;  %178 = vmatprep.subr.mxu1 %v251_v1  ;;  %v32_v7 = vld [vmem:[%s434_s1 + $0x48] sm:$0xff] }
   0x4   :  { %70 = vmatpush1.msra.mxu0 %v37_v2  ;;  %202 = vmatpush1.msra.mxu1 %v37_v2 }
   0x5   :  { %71 = vmatprep.subr.mxu0 %v251_v1  ;;  %179 = vmatprep.subr.mxu1 %v251_v1 }
   0x6   :  { %72 = vmatpush1.msra.mxu0 %v36_v3  ;;  %203 = vmatpush1.msra.mxu1 %v36_v3 }
   0x7   :  { %73 = vmatprep.subr.mxu0 %v251_v1  ;;  %180 = vmatprep.subr.mxu1 %v251_v1 }
   0x8   :  { %74 = vmatpush1.msra.mxu0 %v35_v4  ;;  %204 = vmatpush1.msra.mxu1 %v35_v4 }
   0x9   :  { %75 = vmatprep.subr.mxu0 %v251_v1  ;;  %181 = vmatprep.subr.mxu1 %v251_v1 }
   0xa   :  { %76 = vmatpush1.msra.mxu0 %v34_v5  ;;  %205 = vmatpush1.msra.mxu1 %v34_v5 }
   0xb   :  { %77 = vmatprep.subr.mxu0 %v251_v1  ;;  %182 = vmatprep.subr.mxu1 %v251_v1 }
   0xc   :  { %8 = vsyncpa [#allocation3], 0  ;;  %78 = vmatpush1.msra.mxu0 %v33_v6  ;;  %206 = vmatpush1.msra.mxu1 %v33_v6  ;;  %v31_v8 = vld [vmem:[%s434_s1 + $0x40] sm:$0xff]  ;;  %v30_v9 = vld [vmem:[%s434_s1 + $0x38] sm:$0xff]  ;;  %vm54_vm0 = vcmask 523264   ;;  %s252_s23 = smov [#allocation2]  }
   0xd   :  { %79 = vmatprep.subr.mxu0 %v251_v1  ;;  %183 = vmatprep.subr.mxu1 %v251_v1  ;;  %v29_v10 = vld [vmem:[%s434_s1 + $0x30] sm:$0xff]  ;;  %v28_v11 = vld [vmem:[%s434_s1 + $0x28] sm:$0xff]  ;;  %v27_v12 = vld [vmem:[%s434_s1 + $0x20] sm:$0xff]  ;;  %s161_s24 = sshll.u32 %s252_s23, 4  ;;  %s162_s24 = int_to_ptr.vmem [resolvable:$true] %s161_s24 }
   0xe   :  { %80 = vmatpush1.msra.mxu0 %v32_v7  ;;  %207 = vmatpush1.msra.mxu1 %v32_v7  ;;  %v26_v13 = vld [vmem:[%s434_s1 + $0x18] sm:$0xff]  ;;  %v25_v14 = vld [vmem:[%s434_s1 + $0x10] sm:$0xff]  ;;  %v24_v15 = vld [vmem:[%s434_s1 + $0x8] sm:$0xff]  ;;  %p234_p1 = scmp.lt.s32.totalorder %s162_s24, %s162_s24 }
   0xf   :  { %81 = vmatprep.subr.mxu0 %v251_v1  ;;  %184 = vmatprep.subr.mxu1 %v251_v1  ;;  %v23_v16 = vld [vmem:[%s434_s1] sm:$0xff]  ;;  %v46_v17 = vld [vmem:[%s434_s1 + $0xb8] sm:$0xff]  ;;  %v45_v18 = vld [vmem:[%s434_s1 + $0xb0] sm:$0xff] }
  0x10   :  { %82 = vmatpush1.msra.mxu0 %v31_v8  ;;  %208 = vmatpush1.msra.mxu1 %v31_v8  ;;  %v44_v19 = vld [vmem:[%s434_s1 + $0xa8] sm:$0xff]  ;;  %v43_v20 = vld [vmem:[%s434_s1 + $0xa0] sm:$0xff]  ;;  %v42_v21 = vld [vmem:[%s434_s1 + $0x98] sm:$0xff] }
  0x11   :  { %83 = vmatprep.subr.mxu0 %v251_v1  ;;  %185 = vmatprep.subr.mxu1 %v251_v1  ;;  %v41_v22 = vld [vmem:[%s434_s1 + $0x90] sm:$0xff]  ;;  %v40_v23 = vld [vmem:[%s434_s1 + $0x88] sm:$0xff]  ;;  %v39_v24 = vld [vmem:[%s434_s1 + $0x80] sm:$0xff] }
  0x12   :  { %84 = vmatpush1.msra.mxu0 %v30_v9  ;;  %209 = vmatpush1.msra.mxu1 %v30_v9  ;;  %v16_v25 = vld [vmem:[%s433_s0 + $0x8] sm:$0xff]  ;;  %v15_v27 = vld [vmem:[%s433_s0] sm:$0xff]  ;;  %v18_v29 = vld [vmem:[%s433_s0 + $0x18] sm:$0xff] }
  0x13   :  { %85 = vmatprep.subr.mxu0 %v251_v1  ;;  %186 = vmatprep.subr.mxu1 %v251_v1  ;;  %v20_v26 = vld [vmem:[%s433_s0 + $0x28] sm:$0xff]  ;;  %v19_v28 = vld [vmem:[%s433_s0 + $0x20] sm:$0xff]  ;;  %v22_v30 = vld [vmem:[%s433_s0 + $0x38] sm:$0xff] }
  0x14   :  { %86 = vmatpush1.msra.mxu0 %v29_v10  ;;  %210 = vmatpush1.msra.mxu1 %v29_v10  ;;  %v17_v31 = vld [vmem:[%s433_s0 + $0x10] sm:$0xff]  ;;  %v172_v33 = vld [vmem:[%s435_s2] ss:$0 sm:$0xff] }
  0x15   :  { %87 = vmatprep.subr.mxu0 %v251_v1  ;;  %187 = vmatprep.subr.mxu1 %v251_v1  ;;  %v21_v32 = vld [vmem:[%s433_s0 + $0x30] sm:$0xff]  ;;  %s229_s0 = scalar_lea.vmem %s162_s24, 512 }
  0x16   :  { %88 = vmatpush1.msra.mxu0 %v28_v11  ;;  %211 = vmatpush1.msra.mxu1 %v28_v11  ;;  %p230_p0 = scmp.ne.s32.totalorder %s162_s24, %s229_s0  ;;  %p235_p2 = scmp.lt.s32.totalorder %s229_s0, %s229_s0 }
  0x17   :  { %89 = vmatprep.subr.mxu0 %v251_v1  ;;  %188 = vmatprep.subr.mxu1 %v251_v1 }
  0x18   :  { %90 = vmatpush1.msra.mxu0 %v27_v12  ;;  %212 = vmatpush1.msra.mxu1 %v27_v12  ;;  %p236_p3 = por %p235_p2, %p234_p1 }
  0x19   :  { %91 = vmatprep.subr.mxu0 %v251_v1  ;;  %189 = vmatprep.subr.mxu1 %v251_v1 }
  0x1a   :  { %92 = vmatpush1.msra.mxu0 %v26_v13  ;;  %213 = vmatpush1.msra.mxu1 %v26_v13  ;;  %p237_p4 = pnand %p236_p3, %p230_p0 }
  0x1b   :  { %93 = vmatprep.subr.mxu0 %v251_v1  ;;  %190 = vmatprep.subr.mxu1 %v251_v1 }
  0x1c   :  { %94 = vmatpush1.msra.mxu0 %v25_v14  ;;  %214 = vmatpush1.msra.mxu1 %v25_v14 }
  0x1d   :  { %95 = vmatprep.subr.mxu0 %v251_v1  ;;  %191 = vmatprep.subr.mxu1 %v251_v1 }
  0x1e   :  { %96 = vmatpush1.msra.mxu0 %v24_v15  ;;  %215 = vmatpush1.msra.mxu1 %v24_v15 }
  0x1f   :  { %97 = vmatprep.subr.mxu0 %v251_v1  ;;  %192 = vmatprep.subr.mxu1 %v251_v1 }
  0x20   :  { %98 = vmatpush1.msra.mxu0 %v23_v16  ;;  %216 = vmatpush1.msra.mxu1 %v23_v16 }
  0x21   :  { %115 = vmatprep.subr.mxu0 %v251_v1  ;;  %193 = vmatprep.subr.mxu1 %v251_v1 }
  0x22   :  { %116 = vmatpush2.msra.mxu0 %v46_v17  ;;  %217 = vmatpush2.msra.mxu1 %v46_v17 }
  0x23   :  { %117 = vmatprep.subr.mxu0 %v251_v1  ;;  %194 = vmatprep.subr.mxu1 %v251_v1 }
  0x24   :  { %118 = vmatpush2.msra.mxu0 %v45_v18  ;;  %218 = vmatpush2.msra.mxu1 %v45_v18 }
  0x25   :  { %119 = vmatprep.subr.mxu0 %v251_v1  ;;  %195 = vmatprep.subr.mxu1 %v251_v1 }
  0x26   :  { %120 = vmatpush2.msra.mxu0 %v44_v19  ;;  %219 = vmatpush2.msra.mxu1 %v44_v19 }
  0x27   :  { %121 = vmatprep.subr.mxu0 %v251_v1  ;;  %196 = vmatprep.subr.mxu1 %v251_v1 }
  0x28   :  { %122 = vmatpush2.msra.mxu0 %v43_v20  ;;  %220 = vmatpush2.msra.mxu1 %v43_v20 }
  0x29   :  { %123 = vmatprep.subr.mxu0 %v251_v1  ;;  %197 = vmatprep.subr.mxu1 %v251_v1 }
  0x2a   :  { %124 = vmatpush2.msra.mxu0 %v42_v21  ;;  %221 = vmatpush2.msra.mxu1 %v42_v21 }
  0x2b   :  { %125 = vmatprep.subr.mxu0 %v251_v1  ;;  %198 = vmatprep.subr.mxu1 %v251_v1 }
  0x2c   :  { %126 = vmatpush2.msra.mxu0 %v41_v22  ;;  %222 = vmatpush2.msra.mxu1 %v41_v22 }
  0x2d   :  { %127 = vmatprep.subr.mxu0 %v251_v1  ;;  %199 = vmatprep.subr.mxu1 %v251_v1 }
  0x2e   :  { %128 = vmatpush2.msra.mxu0 %v40_v23  ;;  %223 = vmatpush2.msra.mxu1 %v40_v23 }
  0x2f   :  { %129 = vmatprep.subr.mxu0 %v251_v1  ;;  %200 = vmatprep.subr.mxu1 %v251_v1 }
  0x30   :  { %130 = vmatpush2.msra.mxu0 %v39_v24  ;;  %224 = vmatpush2.msra.mxu1 %v39_v24 }
  0x31   :  { %173 = vmatprep.mubr.msk.f32.mxu0 %vm54_vm0, %v16_v25  ;;  %175 = vmatprep.mubr.msk.f32.mxu1 %vm54_vm0, %v20_v26 }
  0x32   :  { %132 = vmatmul.mubr.f32.vlgmr.msra.gmra.mxu0 %v15_v27  ;;  %142 = vmatmul.mubr.f32.vlgmr.msra.gmra.mxu1 %v19_v28 }
  0x33   :  { %174 = vmatprep.mubr.msk.f32.mxu0 %vm54_vm0, %v18_v29  ;;  %176 = vmatprep.mubr.msk.f32.mxu1 %vm54_vm0, %v22_v30 }
  0x36   :  { %137 = vmatmul.mubr.f32.gmra.mxu0 %v17_v31  ;;  %147 = vmatmul.mubr.f32.gmra.mxu1 %v21_v32 }
  0xf2   :  { %v133_v34 = vpop.f32.mrf.mxu0  ;;  %v143_v35 = vpop.f32.mrf.mxu1 }
  0xf3   :  { %v134_v36 = vadd.f32 %v172_v33, %v133_v34  ;;  %v144_v37 = vadd.f32 %v172_v33, %v143_v35 }
  0xf4   :  { %v135_v38 = vpop.f32.mrf.mxu0  ;;  %v145_v39 = vpop.f32.mrf.mxu1 }
  0xf5   :  { %152 = vst.msk [vmem:[#allocation2] sm:$0xff] %vm54_vm0, %v134_v36  ;;  %154 = vst.msk [vmem:[#allocation2 + $0x10] sm:$0xff] %vm54_vm0, %v144_v37 }
  0xf6   :  { %v138_v40 = vpop.f32.mrf.mxu0  ;;  %v148_v41 = vpop.f32.mrf.mxu1 }
  0xf7   :  { %v139_v42 = vadd.f32 %v172_v33, %v138_v40  ;;  %v149_v43 = vadd.f32 %v172_v33, %v148_v41 }
  0xf8   :  { %v140_v44 = vpop.f32.mrf.mxu0  ;;  %v150_v45 = vpop.f32.mrf.mxu1 }
  0xf9   :  { %153 = vst.msk [vmem:[#allocation2 + $0x8] sm:$0xff] %vm54_vm0, %v139_v42  ;;  %155 = vst.msk [vmem:[#allocation2 + $0x18] sm:$0xff] %vm54_vm0, %v149_v43 }
  0xfa   :  { %240 = shalt.err (!%p237_p4)
}
  0xfb   :  { %s253_s2 = smov 128   ;;  %s254_s25 = smov 8  }
  0xfc   :  { %167 = dma.vmem_to_hbm [thread:$0]  %s162_s24, 512, %s436_s3, [#allocation3], %s253_s2, %s253_s2, %s254_s25  }
  0xfd   :  { %249 = dma.done.wait [#allocation3], 512  }
  0xfe   :  { %250 = vsyncadd [#allocation3], 4294966784 }
  0xff   :  { %171 = vsyncpa [#allocation3], 1 }

</bundles_post_ra>
